<compile_context>
chip_gen: v7x
topology: tpu7x:2x2x1
jax: 0.10.0
libtpu: 0.0.40
codegen_flags: <defaults>
</compile_context>

<pallas_src>
import functools
import math

import jax
import jax.numpy as jnp
from jax.experimental import pallas as pl
from jax.experimental.pallas import tpu as pltpu

_LANES = 128


def _pe_dropout_kernel(seed_ref, x_ref, pe_ref, o_ref, *, keep_prob, row_block, n_cols):
    """Fused (x + pe) + inverted dropout on a lane-dense 2D tile.

    x_ref / pe_ref / o_ref are (row_block, n_cols) tiles of the flattened view;
    pe has already been broadcast over batch, so this is a pure elementwise op.
    """
    # Compute in f32 (v5e has no bf16 VALU/EUP; this is a no-op for f32 inputs).
    y = x_ref[...].astype(jnp.float32) + pe_ref[...].astype(jnp.float32)

    # ---- inverted dropout via a counter-based hash (TPU + interpreter safe) ----
    # Global flat element index of every element in this tile.
    base = (pl.program_id(0) * (row_block * n_cols)).astype(jnp.uint32)
    rows = jax.lax.broadcasted_iota(jnp.uint32, y.shape, 0)
    cols = jax.lax.broadcasted_iota(jnp.uint32, y.shape, 1)
    idx = base + rows * jnp.uint32(n_cols) + cols

    # Mix (seed, element index) with a murmur3-style finalizer so streams for
    # different seeds / different calls are decorrelated.
    h = idx + seed_ref[0].astype(jnp.uint32) * jnp.uint32(0x9E3779B1)
    h = h ^ (h >> 16)
    h = h * jnp.uint32(0x85EBCA6B)
    h = h ^ (h >> 13)
    h = h * jnp.uint32(0xC2B2AE35)
    h = h ^ (h >> 16)

    # Integer-threshold compare: keep iff hash < keep_prob * 2^32.
    threshold = jnp.uint32(min(int(round(keep_prob * float(1 << 32))), (1 << 32) - 1))
    keep = h < threshold

    # Exactly one select + one compile-time-constant multiply.
    inv_keep = 1.0 / keep_prob
    o_ref[...] = (jnp.where(keep, y, 0.0) * inv_keep).astype(o_ref.dtype)


def make_pe_table(d_model, max_len=512):
    """Deterministic sinusoidal table, identical to the torch buffer `pe`."""
    assert d_model % 2 == 0, "sinusoidal PE assumes even d_model (same as torch ref)"
    position = jnp.arange(max_len, dtype=jnp.float32)[:, None]            # (L, 1)
    div_term = jnp.exp(
        jnp.arange(0, d_model, 2, dtype=jnp.float32) * (-math.log(10000.0) / d_model)
    )                                                                     # (D/2,)
    pe = jnp.zeros((max_len, d_model), dtype=jnp.float32)
    pe = pe.at[:, 0::2].set(jnp.sin(position * div_term))
    pe = pe.at[:, 1::2].set(jnp.cos(position * div_term))
    # pe.unsqueeze(0).transpose(0, 1) -> (max_len, 1, d_model)
    return pe[:, None, :]


def _flat_layout(S, B, D):
    """Pick a lane-dense 2D view of the (S, B, D) problem."""
    n = S * B * D
    if D % _LANES == 0:
        return S * B, D              # already lane-dense; rows = (s, b)
    if n % _LANES == 0:
        return n // _LANES, _LANES   # fully flattened lane-dense slab
    return S * B, D                  # fallback: correct, lane-masked stores


def _choose_row_block(n_rows, n_cols, target_bytes=2 << 20):
    """Largest row block with ~target_bytes per operand block (f32).

    3 operands x 2 pipeline buffers x ~2 MiB ~= 12 MiB VMEM, well inside the
    32 MiB scoped default and leaving headroom for v7x's 64 MiB physical VMEM.
    """
    rows = max(8, target_bytes // (n_cols * 4))
    rows = min(rows, n_rows)
    if rows < n_rows:
        rows = max(8, (rows // 8) * 8)   # sublane-aligned blocks
    return rows


def positional_encoding_forward(x, pe, *, dropout=0.0, training=False, seed=0):
    """x: (S, B, D);  pe: (max_len, 1, D). Matches PositionalEncoding.forward."""
    S, B, D = x.shape
    pe_s = pe[:S]                                    # (S, 1, D)

    if (not training) or dropout <= 0.0:
        # nn.Dropout is the identity here; a bare elementwise add is best left
        # to XLA fusion (pallas_call fixed overhead dominates for this op).
        return (x + pe_s).astype(x.dtype)

    # Training path: fused add + inverted dropout in one Pallas kernel on a
    # lane-dense, sublane-full 2D slab.
    # TODO(synk): for D % 128 == 0 and B >= 8, a 3-D (S_blk, B, D) blocking would
    # avoid materializing the pe broadcast (one fewer x-sized HBM stream).
    n_rows, n_cols = _flat_layout(S, B, D)
    x2 = x.reshape(n_rows, n_cols)
    pe2 = jnp.broadcast_to(pe_s, (S, B, D)).reshape(n_rows, n_cols)
    row_block = _choose_row_block(n_rows, n_cols)
    grid = (pl.cdiv(n_rows, row_block),)

    kernel = functools.partial(
        _pe_dropout_kernel,
        keep_prob=1.0 - float(dropout),
        row_block=row_block,
        n_cols=n_cols,
    )

    out2 = pl.pallas_call(
        kernel,
        out_shape=jax.ShapeDtypeStruct((n_rows, n_cols), x.dtype),
        grid_spec=pltpu.PrefetchScalarGridSpec(
            num_scalar_prefetch=1,                    # RNG seed lives in SMEM
            grid=grid,
            in_specs=[
                pl.BlockSpec((row_block, n_cols), lambda i, seed_ref: (i, 0)),
                pl.BlockSpec((row_block, n_cols), lambda i, seed_ref: (i, 0)),
            ],
            out_specs=pl.BlockSpec((row_block, n_cols), lambda i, seed_ref: (i, 0)),
        ),
        # Grid steps are independent -> shard across v7x's 2 TensorCores.
        compiler_params=pltpu.CompilerParams(dimension_semantics=("parallel",)),
    )(jnp.asarray([seed], dtype=jnp.int32), x2, pe2)

    return out2.reshape(S, B, D)


if __name__ == "__main__":
    S, B, D = 8, 2, 32          # seq=8, batch=2, d_model=32
    dropout_rate = 0.1
    max_len = 512

    key = jax.random.PRNGKey(0)
    x = jax.random.normal(key, (S, B, D), dtype=jnp.float32)
    pe = make_pe_table(D, max_len=max_len)
    ref = x + pe[:S]

    # Eval mode: dropout is identity; wrapper bypasses Pallas (plain fused add).
    out_eval = positional_encoding_forward(x, pe, dropout=dropout_rate, training=False)
    out_eval = jax.block_until_ready(out_eval)
    assert out_eval.shape == (S, B, D)
    assert jnp.allclose(out_eval, ref, atol=1e-6), "eval-mode mismatch vs reference"

    # Train mode: Pallas kernel (fused add + inverted dropout).
    # TODO(synk): torch's RNG stream cannot be reproduced bit-exactly; dropout
    # semantics (Bernoulli(keep_prob) + 1/keep_prob scaling) are matched.
    out_tr = positional_encoding_forward(
        x, pe, dropout=dropout_rate, training=True, seed=42
    )
    out_tr = jax.block_until_ready(out_tr)
    assert out_tr.shape == (S, B, D)
    assert bool(jnp.all(jnp.isfinite(out_tr)))

    keep_prob = 1.0 - dropout_rate
    scaled_ref = ref / keep_prob
    # Every element is either dropped (exactly 0) or equals (x + pe)/keep_prob.
    ok = jnp.isclose(out_tr, 0.0, atol=1e-6) | jnp.isclose(
        out_tr, scaled_ref, rtol=1e-5, atol=1e-5
    )
    assert bool(jnp.all(ok)), "dropout semantics mismatch"
    drop_frac = float(jnp.mean((out_tr == 0.0).astype(jnp.float32)))
    assert 0.0 < drop_frac < 0.5, f"implausible drop fraction {drop_frac}"

    print("KERNEL_OK")
</pallas_src>

<mosaic_0001>
module attributes {stable_mosaic.version = 11 : i64} {
  func.func @_pe_dropout_kernel(%arg0: i32, %arg1: memref<1xi32, #tpu.memory_space<smem>>, %arg2: memref<4x128xf32, #tpu.memory_space<vmem>>, %arg3: memref<4x128xf32, #tpu.memory_space<vmem>>, %arg4: memref<4x128xf32, #tpu.memory_space<vmem>>) attributes {dimension_semantics = [#tpu.dimension_semantics<parallel>], iteration_bounds = array<i64: 1>, scalar_prefetch = 1 : i64, scratch_operands = 0 : i64, tpu.core_type = #tpu.core_type<tc>, window_params = [{transform_indices = @transform_0, window_bounds = array<i64: 4, 128>}, {transform_indices = @transform_1, window_bounds = array<i64: 4, 128>}, {transform_indices = @transform_2, window_bounds = array<i64: 4, 128>}]} {
    %c0 = arith.constant 0 : index
    %c0_0 = arith.constant 0 : index
    %0 = vector.load %arg2[%c0, %c0_0] : memref<4x128xf32, #tpu.memory_space<vmem>>, vector<4x128xf32>
    %c0_1 = arith.constant 0 : index
    %c0_2 = arith.constant 0 : index
    %1 = vector.load %arg3[%c0_1, %c0_2] : memref<4x128xf32, #tpu.memory_space<vmem>>, vector<4x128xf32>
    %2 = arith.addf %0, %1 : vector<4x128xf32>
    %c512_i32 = arith.constant 512 : i32
    %3 = arith.muli %arg0, %c512_i32 : i32
    %4 = tpu.iota {dimensions = array<i32: 0>} : vector<4x128xi32>
    %5 = tpu.iota {dimensions = array<i32: 1>} : vector<4x128xi32>
    %c128_i32 = arith.constant 128 : i32
    %6 = vector.broadcast %c128_i32 : i32 to vector<4x128xi32>
    %7 = arith.muli %4, %6 : vector<4x128xi32>
    %8 = vector.broadcast %3 : i32 to vector<4x128xi32>
    %9 = arith.addi %8, %7 : vector<4x128xi32>
    %10 = arith.addi %9, %5 : vector<4x128xi32>
    %c0_3 = arith.constant 0 : index
    %11 = memref.load %arg1[%c0_3] : memref<1xi32, #tpu.memory_space<smem>>
    %c-1640531535_i32 = arith.constant -1640531535 : i32
    %12 = arith.muli %11, %c-1640531535_i32 : i32
    %13 = vector.broadcast %12 : i32 to vector<4x128xi32>
    %14 = arith.addi %10, %13 : vector<4x128xi32>
    %c16_i32 = arith.constant 16 : i32
    %15 = vector.broadcast %c16_i32 : i32 to vector<4x128xi32>
    %16 = arith.shrui %14, %15 : vector<4x128xi32>
    %17 = arith.xori %14, %16 : vector<4x128xi32>
    %c-2048144789_i32 = arith.constant -2048144789 : i32
    %18 = vector.broadcast %c-2048144789_i32 : i32 to vector<4x128xi32>
    %19 = arith.muli %17, %18 : vector<4x128xi32>
    %c13_i32 = arith.constant 13 : i32
    %20 = vector.broadcast %c13_i32 : i32 to vector<4x128xi32>
    %21 = arith.shrui %19, %20 : vector<4x128xi32>
    %22 = arith.xori %19, %21 : vector<4x128xi32>
    %c-1028477387_i32 = arith.constant -1028477387 : i32
    %23 = vector.broadcast %c-1028477387_i32 : i32 to vector<4x128xi32>
    %24 = arith.muli %22, %23 : vector<4x128xi32>
    %c16_i32_4 = arith.constant 16 : i32
    %25 = vector.broadcast %c16_i32_4 : i32 to vector<4x128xi32>
    %26 = arith.shrui %24, %25 : vector<4x128xi32>
    %27 = arith.xori %24, %26 : vector<4x128xi32>
    %c-429496730_i32 = arith.constant -429496730 : i32
    %28 = vector.broadcast %c-429496730_i32 : i32 to vector<4x128xi32>
    %29 = arith.cmpi ult, %27, %28 : vector<4x128xi32>
    %cst = arith.constant 0.000000e+00 : f32
    %30 = vector.broadcast %cst : f32 to vector<4x128xf32>
    %31 = arith.select %29, %2, %30 : vector<4x128xi1>, vector<4x128xf32>
    %cst_5 = arith.constant 1.11111116 : f32
    %32 = vector.broadcast %cst_5 : f32 to vector<4x128xf32>
    %33 = arith.mulf %31, %32 : vector<4x128xf32>
    %c0_6 = arith.constant 0 : index
    %c0_7 = arith.constant 0 : index
    %34 = vector.load %arg4[%c0_6, %c0_7] : memref<4x128xf32, #tpu.memory_space<vmem>>, vector<4x128xf32>
    tpu.vector_store %arg4[%c0_6, %c0_7], %33 {strides = array<i32>} : memref<4x128xf32, #tpu.memory_space<vmem>>, vector<4x128xf32>,
    return
  }
  func.func @transform_0(%arg0: i32, %arg1: memref<1xi32, #tpu.memory_space<smem>>) -> (i32, i32) {
    %c0_i32 = arith.constant 0 : i32
    %c0_i32_0 = arith.constant 0 : i32
    return %arg0, %c0_i32 : i32, i32
  }
  func.func @transform_1(%arg0: i32, %arg1: memref<1xi32, #tpu.memory_space<smem>>) -> (i32, i32) {
    %c0_i32 = arith.constant 0 : i32
    %c0_i32_0 = arith.constant 0 : i32
    return %arg0, %c0_i32 : i32, i32
  }
  func.func @transform_2(%arg0: i32, %arg1: memref<1xi32, #tpu.memory_space<smem>>) -> (i32, i32) {
    %c0_i32 = arith.constant 0 : i32
    %c0_i32_0 = arith.constant 0 : i32
    return %arg0, %c0_i32 : i32, i32
  }
}

</mosaic_0001>

<bundles_post_ra>
// kernel: tpu_custom_call.1
= control target key start
LH: loop header
LB: loop body
LE: loop exit
PB: predicated region body
PF: predicated region fallthrough
CT: control target
= control target key end

     0   :  { %9 = vsyncpa [#allocation5], 0  ;;  %s171_s0 = inlined_call_operand.<no memory space> [shape: s32[1], index: 0, kind: input, shape index: {}]   ;;  %s172_s1 = inlined_call_operand.hbm [shape: f32[4,128], index: 1, kind: input, shape index: {}]   ;;  %s173_s2 = inlined_call_operand.vmem [shape: f32[4,128], index: 2, kind: input, shape index: {}]   ;;  %s174_s3 = inlined_call_operand.hbm [shape: f32[4,128], index: 3, kind: output, shape index: {}]  }
   0x1   :  { %10 = vsyncpa [#allocation6], 0  ;;  %s119_s12 = smov [#allocation4]   ;;  %s71_s16 = scalar_lea.hbm %s172_s1, 64 }
   0x2   :  { %s17_s13 = sshll.u32 %s119_s12, 4  ;;  %p72_p0 = scmp.ne.s32.totalorder %s172_s1, %s71_s16  ;;  %s18_s13 = int_to_ptr.vmem [resolvable:$true] %s17_s13 }
   0x3   :  { %p75_p1 = scmp.lt.u32.totalorder %s71_s16, %s172_s1 }
   0x5   :  { %p77_p2 = pnand %p75_p1, %p72_p0 }
   0x7   :  { %80 = shalt.err (!%p77_p2)
}
   0x8   :  { %s81_s21 = scalar_lea.vmem %s18_s13, 64  ;;  %p86_p4 = scmp.lt.s32.totalorder %s18_s13, %s18_s13 }
   0x9   :  { %p82_p3 = scmp.ne.s32.totalorder %s18_s13, %s81_s21  ;;  %p87_p5 = scmp.lt.s32.totalorder %s81_s21, %s81_s21 }
   0xb   :  { %p88_p6 = por %p87_p5, %p86_p4 }
   0xd   :  { %p89_p7 = pnand %p88_p6, %p82_p3 }
   0xf   :  { %92 = shalt.err (!%p89_p7)
}
  0x10   :  { %20 = dma.hbm_to_vmem [thread:$0]  %s172_s1, 64, %s18_s13, [#allocation5]  }
  0x11   :  { %115 = dma.done.wait [#allocation5], 64  }
  0x12   :  { %116 = vsyncadd [#allocation5], 4294967232  ;;  %v30_v0 = vlaneseq  ;;  %s39_s26 = smul.u32 2654435761, %s171_s0  ;;  %v26_v12 = vld [vmem:[#allocation4] sm:$0xf] }
  0x13   :  { %v27_v13 = vld [vmem:[%s173_s2] sm:$0xf]  ;;  %s120_s0 = smov [#allocation7]  }
  0x14   :  { %v31_v1 = vshrl.u32 %v30_v0, 7  ;;  %v33_v2 = vand.u32 127, %v30_v0  ;;  %v40_v4 = vstv %s39_s26  ;;  %v28_v16 = vadd.f32 %v27_v13, %v26_v12  ;;  %s60_s28 = sshll.u32 %s120_s0, 4  ;;  %s61_s28 = int_to_ptr.vmem [resolvable:$true] %s60_s28 }
  0x15   :  { %s93_s29 = scalar_lea.vmem %s61_s28, 64  ;;  %p98_p9 = scmp.lt.s32.totalorder %s61_s28, %s61_s28 }
  0x16   :  { %v34_v3 = vmul.u32 128, %v31_v1  ;;  %p94_p8 = scmp.ne.s32.totalorder %s61_s28, %s93_s29  ;;  %p99_p10 = scmp.lt.s32.totalorder %s93_s29, %s93_s29 }
  0x18   :  { %v37_v5 = vadd.s32 %v34_v3, %v33_v2  ;;  %p100_p11 = por %p99_p10, %p98_p9 }
  0x1a   :  { %v41_v6 = vadd.s32 %v40_v4, %v37_v5  ;;  %p101_p12 = pnand %p100_p11, %p94_p8 }
  0x1c   :  { %v42_v7 = vshrl.u32 %v41_v6, 16 }
  0x1e   :  { %v43_v8 = vxor.u32 %v42_v7, %v41_v6 }
  0x20   :  { %v44_v9 = vmul.u32 2246822507, %v43_v8 }
  0x22   :  { %v45_v10 = vshrl.u32 %v44_v9, 13 }
  0x24   :  { %v46_v11 = vxor.u32 %v45_v10, %v44_v9 }
  0x26   :  { %v47_v14 = vmul.u32 3266489909, %v46_v11 }
  0x28   :  { %v48_v15 = vshrl.u32 %v47_v14, 16 }
  0x2a   :  { %v49_v17 = vxor.u32 %v48_v15, %v47_v14 }
  0x2c   :  { %vm50_vm0 = vcmp.lt.u32.totalorder %v49_v17, 3865470566 }
  0x2d   :  { %v51_v18 = vsel %vm50_vm0, %v28_v16, 0.0 }
  0x2e   :  { %v52_v19 = vmul.f32 1.1111112, %v51_v18 }
  0x30   :  { %53 = vst [vmem:[#allocation7] sm:$0xf] %v52_v19 }
  0x31   :  { %104 = shalt.err (!%p101_p12)
}
  0x32   :  { %s105_s4 = scalar_lea.hbm %s174_s3, 64 }
  0x33   :  { %p106_p13 = scmp.ne.s32.totalorder %s174_s3, %s105_s4  ;;  %p109_p0 = scmp.lt.u32.totalorder %s105_s4, %s174_s3 }
  0x35   :  { %p111_p1 = pnand %p109_p0, %p106_p13 }
  0x37   :  { %114 = shalt.err (!%p111_p1)
}
  0x38   :  { %63 = dma.vmem_to_hbm [thread:$0]  %s61_s28, 64, %s174_s3, [#allocation6]  }
  0x39   :  { %117 = dma.done.wait [#allocation6], 64  }
  0x3a   :  { %118 = vsyncadd [#allocation6], 4294967232 }
  0x3b   :  { %67 = vsyncpa [#allocation5], 1 }
  0x3c   :  { %68 = vsyncpa [#allocation6], 1 }

</bundles_post_ra>
